<compile_context>
chip_gen: v7x
topology: tpu7x:2x2x1
jax: 0.10.0
libtpu: 0.0.40
codegen_flags: <defaults>
</compile_context>

<pallas_src>
import functools

import jax
import jax.numpy as jnp
from jax import lax
from jax.experimental import pallas as pl
from jax.experimental.pallas import tpu as pltpu


# ---------------------------------------------------------------------------
# Kernel: per-row instance norm + conditional affine on a [ROWS, H*W] block
# ---------------------------------------------------------------------------
def _cin_rows_kernel(x_ref, gb_ref, o_ref, *, eps, inv_n):
    x = x_ref[...].astype(jnp.float32)                       # (R, HW), single f32 cast

    # Two-pass moments in f32 (biased variance, matching nn.InstanceNorm2d).
    mean = jnp.sum(x, axis=1, keepdims=True) * inv_n          # (R, 1)
    xm = x - mean                                             # reused for the apply pass
    var = jnp.sum(xm * xm, axis=1, keepdims=True) * inv_n     # (R, 1), >= 0 by construction
    rstd = lax.rsqrt(var + eps)                               # EUP

    gb = gb_ref[...].astype(jnp.float32)                      # (R, 2): [gamma | beta]
    gamma = gb[:, 0:1]
    beta = gb[:, 1:2]

    # Fold gamma*rstd into one scale; single FMA over the tile.
    o_ref[...] = (xm * (gamma * rstd) + beta).astype(o_ref.dtype)


# ---------------------------------------------------------------------------
# Helpers
# ---------------------------------------------------------------------------
def _round_up(v, m):
    return ((v + m - 1) // m) * m


def _choose_rows_per_block(nr, row_bytes, sub, target_bytes):
    """Pick rows-per-block: multiple of the sublane tile, ~target_bytes per block,
    preferring exact divisors of nr (no partial blocks) and >=2 grid blocks (megacore)."""
    budget = max(sub, (target_bytes // max(row_bytes, 1)) // sub * sub)

    if nr % sub == 0:
        # Prefer a divisor that yields >=2 grid blocks, then any divisor.
        for cap in (min(budget, max(sub, nr // 2)), min(budget, nr)):
            d = (cap // sub) * sub
            while d >= sub:
                if nr % d == 0:
                    return d
                d -= sub

    if nr < sub:
        # Single block equal to the full first dim (allowed by the (8,128) rule).
        return nr

    # Fall back: multiple of sub <= nr, partial last block handled by Pallas.
    return min(budget, (nr // sub) * sub)


# ---------------------------------------------------------------------------
# Wrapper (forward pass of ConditionalInstanceNorm2d)
# ---------------------------------------------------------------------------
def conditional_instance_norm_2d(x, angles, w1, b1, w2, b2, *, eps=1e-5,
                                 target_block_bytes=4 * 1024 * 1024):
    B, C, H, W = x.shape
    HW = H * W
    NR = B * C
    itemsize = jnp.dtype(x.dtype).itemsize

    # --- angle encoder MLP in plain XLA (orders of magnitude below MXU tile) ---
    h = jnp.maximum(
        angles.astype(jnp.float32) @ w1.astype(jnp.float32) + b1.astype(jnp.float32),
        0.0,
    )
    params = h @ w2.astype(jnp.float32) + b2.astype(jnp.float32)   # (B, 2C)
    gamma = params[:, :C].reshape(NR)
    beta = params[:, C:].reshape(NR)
    gb = jnp.stack([gamma, beta], axis=-1)                          # (B*C, 2) packed

    # --- lane-dense 2-D view: one row per (b, c) plane (free reshape) ---
    x2 = x.reshape(NR, HW)

    # dtype-aware sublane tile: 8 rows (f32), 16 (bf16/f16), 32 (int8/fp8)
    sub = {4: 8, 2: 16, 1: 32}.get(itemsize, 8)
    row_bytes = HW * itemsize
    rpb = _choose_rows_per_block(NR, row_bytes, sub, target_block_bytes)
    grid = (pl.cdiv(NR, rpb),)

    # VMEM budget: 2x-buffered input + 2x-buffered output + f32 working copies, <= 48 MiB
    # (fits v7x's 64 MiB/TC with headroom; well under v5e/v6e's 128 MiB).
    block_in_bytes = rpb * HW * itemsize
    block_f32_bytes = rpb * HW * 4
    vmem_limit = min(48 * 1024 * 1024,
                     max(32 * 1024 * 1024,
                         4 * block_in_bytes + 3 * block_f32_bytes + (2 << 20)))

    out2 = pl.pallas_call(
        functools.partial(_cin_rows_kernel, eps=float(eps), inv_n=1.0 / HW),
        grid=grid,
        in_specs=[
            pl.BlockSpec((rpb, HW), lambda i: (i, 0)),   # x rows
            pl.BlockSpec((rpb, 2), lambda i: (i, 0)),    # packed [gamma | beta]
        ],
        out_specs=pl.BlockSpec((rpb, HW), lambda i: (i, 0)),
        out_shape=jax.ShapeDtypeStruct((NR, HW), x.dtype),
        compiler_params=pltpu.CompilerParams(
            dimension_semantics=("parallel",),            # shards rows across TCs on v7x
            vmem_limit_bytes=int(vmem_limit),
        ),
        cost_estimate=pl.CostEstimate(
            flops=6 * NR * HW,
            transcendentals=NR,
            bytes_accessed=2 * NR * HW * itemsize + NR * 8,
        ),
    )(x2, gb)

    return out2.reshape(B, C, H, W)


# ---------------------------------------------------------------------------
# Pure-JAX reference (mirrors the PyTorch forward) for a sanity check
# ---------------------------------------------------------------------------
def reference(x, angles, w1, b1, w2, b2, *, eps=1e-5):
    C = x.shape[1]
    mean = x.mean(axis=(2, 3), keepdims=True)
    var = ((x - mean) ** 2).mean(axis=(2, 3), keepdims=True)
    normalized = (x - mean) / jnp.sqrt(var + eps)
    h = jnp.maximum(angles @ w1 + b1, 0.0)
    p = h @ w2 + b2
    gamma = p[:, :C][:, :, None, None]
    beta = p[:, C:][:, :, None, None]
    return gamma * normalized + beta


if __name__ == "__main__":
    # Small shapes consistent with the module's forward
    B, C, H, W = 2, 4, 16, 16
    angle_dim, hidden_dim = 4, 32

    key = jax.random.PRNGKey(0)
    kx, ka, kw1, kb1 = jax.random.split(key, 4)

    x = jax.random.normal(kx, (B, C, H, W), dtype=jnp.float32)
    angles = jax.random.normal(ka, (B, angle_dim), dtype=jnp.float32)

    # angle_encoder[0]: Linear(angle_dim, hidden_dim) — deterministic random init
    w1 = jax.random.normal(kw1, (angle_dim, hidden_dim), dtype=jnp.float32) * 0.1
    b1 = jax.random.normal(kb1, (hidden_dim,), dtype=jnp.float32) * 0.1
    # angle_encoder[-1]: Linear(hidden_dim, 2C) — per _initialize_parameters:
    # weight = 0, bias[:C] = 1 (unit gamma), bias[C:] = 0 (zero beta)
    w2 = jnp.zeros((hidden_dim, 2 * C), dtype=jnp.float32)
    b2 = jnp.concatenate(
        [jnp.ones((C,), dtype=jnp.float32), jnp.zeros((C,), dtype=jnp.float32)]
    )

    out = conditional_instance_norm_2d(x, angles, w1, b1, w2, b2)
    out = jax.block_until_ready(out)

    ref = reference(x, angles, w1, b1, w2, b2)
    assert out.shape == (B, C, H, W)
    assert jnp.allclose(out, ref, atol=1e-4, rtol=1e-4), (
        f"max abs err = {jnp.max(jnp.abs(out - ref))}"
    )

    print("KERNEL_OK")
</pallas_src>

<mosaic_0001>
module attributes {stable_mosaic.version = 11 : i64} {
  func.func @_cin_rows_kernel(%arg0: i32, %arg1: memref<8x256xf32, #tpu.memory_space<vmem>>, %arg2: memref<8x2xf32, #tpu.memory_space<vmem>>, %arg3: memref<8x256xf32, #tpu.memory_space<vmem>>) attributes {dimension_semantics = [#tpu.dimension_semantics<parallel>], iteration_bounds = array<i64: 1>, scalar_prefetch = 0 : i64, scratch_operands = 0 : i64, tpu.core_type = #tpu.core_type<tc>, window_params = [{transform_indices = @transform_0, window_bounds = array<i64: 8, 256>}, {transform_indices = @transform_1, window_bounds = array<i64: 8, 2>}, {transform_indices = @transform_2, window_bounds = array<i64: 8, 256>}]} {
    %c0 = arith.constant 0 : index
    %c0_0 = arith.constant 0 : index
    %0 = vector.load %arg1[%c0, %c0_0] : memref<8x256xf32, #tpu.memory_space<vmem>>, vector<8x256xf32>
    %cst = arith.constant dense<0.000000e+00> : vector<8xf32>
    %1 = vector.multi_reduction <add>, %0, %cst [1] : vector<8x256xf32> to vector<8xf32>
    %2 = vector.shape_cast %1 : vector<8xf32> to vector<8x1xf32>
    %cst_1 = arith.constant 3.906250e-03 : f32
    %3 = vector.broadcast %cst_1 : f32 to vector<8x1xf32>
    %4 = arith.mulf %2, %3 : vector<8x1xf32>
    %5 = vector.broadcast %4 : vector<8x1xf32> to vector<8x256xf32>
    %6 = arith.subf %0, %5 : vector<8x256xf32>
    %7 = arith.mulf %6, %6 : vector<8x256xf32>
    %cst_2 = arith.constant dense<0.000000e+00> : vector<8xf32>
    %8 = vector.multi_reduction <add>, %7, %cst_2 [1] : vector<8x256xf32> to vector<8xf32>
    %9 = vector.shape_cast %8 : vector<8xf32> to vector<8x1xf32>
    %cst_3 = arith.constant 3.906250e-03 : f32
    %10 = vector.broadcast %cst_3 : f32 to vector<8x1xf32>
    %11 = arith.mulf %9, %10 : vector<8x1xf32>
    %cst_4 = arith.constant 9.99999974E-6 : f32
    %12 = vector.broadcast %cst_4 : f32 to vector<8x1xf32>
    %13 = arith.addf %11, %12 : vector<8x1xf32>
    %14 = math.rsqrt %13 : vector<8x1xf32>
    %c0_5 = arith.constant 0 : index
    %c0_6 = arith.constant 0 : index
    %15 = vector.load %arg2[%c0_5, %c0_6] : memref<8x2xf32, #tpu.memory_space<vmem>>, vector<8x2xf32>
    %16 = vector.extract_strided_slice %15 {offsets = [0, 0], sizes = [8, 1], strides = [1, 1]} : vector<8x2xf32> to vector<8x1xf32>
    %17 = vector.extract_strided_slice %15 {offsets = [0, 1], sizes = [8, 1], strides = [1, 1]} : vector<8x2xf32> to vector<8x1xf32>
    %18 = arith.mulf %16, %14 : vector<8x1xf32>
    %19 = vector.broadcast %18 : vector<8x1xf32> to vector<8x256xf32>
    %20 = arith.mulf %6, %19 : vector<8x256xf32>
    %21 = vector.broadcast %17 : vector<8x1xf32> to vector<8x256xf32>
    %22 = arith.addf %20, %21 : vector<8x256xf32>
    %c0_7 = arith.constant 0 : index
    %c0_8 = arith.constant 0 : index
    %23 = vector.load %arg3[%c0_7, %c0_8] : memref<8x256xf32, #tpu.memory_space<vmem>>, vector<8x256xf32>
    tpu.vector_store %arg3[%c0_7, %c0_8], %22 {strides = array<i32>} : memref<8x256xf32, #tpu.memory_space<vmem>>, vector<8x256xf32>,
    return
  }
  func.func @transform_0(%arg0: i32) -> (i32, i32) {
    %c0_i32 = arith.constant 0 : i32
    %c0_i32_0 = arith.constant 0 : i32
    return %arg0, %c0_i32 : i32, i32
  }
  func.func @transform_1(%arg0: i32) -> (i32, i32) {
    %c0_i32 = arith.constant 0 : i32
    %c0_i32_0 = arith.constant 0 : i32
    return %arg0, %c0_i32 : i32, i32
  }
  func.func @transform_2(%arg0: i32) -> (i32, i32) {
    %c0_i32 = arith.constant 0 : i32
    %c0_i32_0 = arith.constant 0 : i32
    return %arg0, %c0_i32 : i32, i32
  }
}

</mosaic_0001>

<bundles_post_ra>
// kernel: tpu_custom_call.1
= control target key start
LH: loop header
LB: loop body
LE: loop exit
PB: predicated region body
PF: predicated region fallthrough
CT: control target
= control target key end

     0   :  { %7 = vsyncpa [#allocation3], 0  ;;  %s176_s0 = inlined_call_operand.hbm [shape: f32[8,256], index: 0, kind: input, shape index: {}]   ;;  %s177_s1 = inlined_call_operand.vmem [shape: f32[8,2], index: 1, kind: input, shape index: {}]   ;;  %s178_s2 = inlined_call_operand.hbm [shape: f32[8,256], index: 2, kind: output, shape index: {}]  }
   0x1   :  { %8 = vsyncpa [#allocation4], 0  ;;  %s130_s9 = smov [#allocation2]   ;;  %s82_s13 = scalar_lea.hbm %s176_s0, 256 }
   0x2   :  { %s15_s10 = sshll.u32 %s130_s9, 4  ;;  %p83_p0 = scmp.ne.s32.totalorder %s176_s0, %s82_s13  ;;  %s16_s10 = int_to_ptr.vmem [resolvable:$true] %s15_s10 }
   0x3   :  { %p86_p1 = scmp.lt.u32.totalorder %s82_s13, %s176_s0 }
   0x5   :  { %p88_p2 = pnand %p86_p1, %p83_p0 }
   0x7   :  { %91 = shalt.err (!%p88_p2)
}
   0x8   :  { %s92_s18 = scalar_lea.vmem %s16_s10, 256  ;;  %p97_p4 = scmp.lt.s32.totalorder %s16_s10, %s16_s10 }
   0x9   :  { %p93_p3 = scmp.ne.s32.totalorder %s16_s10, %s92_s18  ;;  %p98_p5 = scmp.lt.s32.totalorder %s92_s18, %s92_s18 }
   0xb   :  { %p99_p6 = por %p98_p5, %p97_p4 }
   0xd   :  { %p100_p7 = pnand %p99_p6, %p93_p3 }
   0xf   :  { %103 = shalt.err (!%p100_p7)
}
  0x10   :  { %18 = dma.hbm_to_vmem [thread:$0]  %s176_s0, 256, %s16_s10, [#allocation3]  }
  0x11   :  { %126 = dma.done.wait [#allocation3], 256  }
  0x12   :  { %127 = vsyncadd [#allocation3], 4294967040  ;;  %v24_v0 = vld [vmem:[#allocation2] sm:$0xff]  ;;  %v25_v1 = vld [vmem:[#allocation2 + $0x8] sm:$0xff]  ;;  %v131_v10 = vmov 0   ;;  %v132_v11 = vmov 1  }
  0x13   :  { %v26_v2 = vadd.f32 %v25_v1, %v24_v0  ;;  %77 = vset.pattern.permute.xlu1 %v131_v10  ;;  %79 = vset.pattern.permute.xlu0 %v132_v11  ;;  %v40_v15 = vld [vmem:[%s177_s1] sm:$0xff]  ;;  %s133_s22 = smov [#allocation5]  }
  0x14   :  { %s64_s23 = sshll.u32 %s133_s22, 4  ;;  %s65_s23 = int_to_ptr.vmem [resolvable:$true] %s64_s23 }
  0x15   :  { %27 = vadd.xlane.f32.xlu0 %v26_v2  ;;  %s104_s24 = scalar_lea.vmem %s65_s23, 256  ;;  %p109_p9 = scmp.lt.s32.totalorder %s65_s23, %s65_s23 }
  0x16   :  { %p105_p8 = scmp.ne.s32.totalorder %s65_s23, %s104_s24  ;;  %p110_p10 = scmp.lt.s32.totalorder %s104_s24, %s104_s24 }
  0x18   :  { %p111_p11 = por %p110_p10, %p109_p9 }
  0x1a   :  { %p112_p12 = pnand %p111_p11, %p105_p8 }
  0xa2   :  { %v28_v3 = vpop.xlane.xlu0 %27 }
  0xa3   :  { %v29_v4 = vmul.f32 0.00390625, %v28_v3 }
  0xa5   :  { %v30_v5 = vsub.f32 %v24_v0, %v29_v4  ;;  %v31_v6 = vsub.f32 %v25_v1, %v29_v4 }
  0xa7   :  { %v32_v7 = vmul.f32 %v30_v5, %v30_v5  ;;  %v33_v8 = vmul.f32 %v31_v6, %v31_v6 }
  0xa9   :  { %v34_v9 = vadd.f32 %v33_v8, %v32_v7 }
  0xab   :  { %35 = vadd.xlane.f32.xlu0 %v34_v9 }
 0x138   :  { %v36_v12 = vpop.xlane.xlu0 %35 }
 0x139   :  { %v37_v13 = vmul.f32 0.00390625, %v36_v12 }
 0x13b   :  { %v38_v14 = vadd.f32 1e-05, %v37_v13 }
 0x13d   :  { %80 = vrsqrt.f32 %v38_v14 }
 0x147   :  { %v81_v16 = vpop.eup %80 }
 0x148   :  { %v41_v17 = vmul.f32 %v81_v16, %v40_v15 }
 0x14a   :  { %44 = vperm.xlu1 %77, %v41_v17  }
 0x14e   :  { %78 = vset.pattern.permute.xlu1 %v132_v11 }
 0x14f   :  { %51 = vperm.xlu1 %78, %v40_v15  }
 0x1c9   :  { %v45_v18 = vpop.permute.xlu1 %44 }
 0x1ca   :  { %v47_v19 = vmul.f32 %v45_v18, %v30_v5  ;;  %v48_v20 = vmul.f32 %v45_v18, %v31_v6 }
 0x1ce   :  { %v52_v21 = vpop.permute.xlu1 %51 }
 0x1cf   :  { %v54_v22 = vadd.f32 %v52_v21, %v47_v19  ;;  %v55_v23 = vadd.f32 %v52_v21, %v48_v20 }
 0x1d1   :  { %56 = vst [vmem:[#allocation5] sm:$0xff] %v54_v22  ;;  %57 = vst [vmem:[#allocation5 + $0x8] sm:$0xff] %v55_v23 }
 0x1d2   :  { %115 = shalt.err (!%p112_p12)
}
 0x1d3   :  { %s116_s26 = scalar_lea.hbm %s178_s2, 256 }
 0x1d4   :  { %p117_p13 = scmp.ne.s32.totalorder %s178_s2, %s116_s26  ;;  %p120_p0 = scmp.lt.u32.totalorder %s116_s26, %s178_s2 }
 0x1d6   :  { %p122_p1 = pnand %p120_p0, %p117_p13 }
 0x1d8   :  { %125 = shalt.err (!%p122_p1)
}
 0x1d9   :  { %67 = dma.vmem_to_hbm [thread:$0]  %s65_s23, 256, %s178_s2, [#allocation4]  }
 0x1da   :  { %128 = dma.done.wait [#allocation4], 256  }
 0x1db   :  { %129 = vsyncadd [#allocation4], 4294967040 }
 0x1dc   :  { %71 = vsyncpa [#allocation3], 1 }
 0x1dd   :  { %72 = vsyncpa [#allocation4], 1 }

</bundles_post_ra>
